<compile_context>
chip_gen: v7x
topology: tpu7x:2x2x1
jax: 0.10.0
libtpu: 0.0.40
codegen_flags: <defaults>
</compile_context>

<pallas_src>
import functools

import jax
import jax.numpy as jnp
from jax import lax
from jax.experimental import pallas as pl
from jax.experimental.pallas import tpu as pltpu


def _pq_kernel(slab_ref, o_ref, *, B, d):
    # slab_ref rows: [0,d) = P, [d,2d) = Q, [2d, 2d+B*d) = A, [2d+B*d, +B) = x
    p = slab_ref[pl.ds(0, d), :]                           # (d, d)
    q = slab_ref[pl.ds(d, d), :]                           # (d, d)
    a = slab_ref[pl.ds(2 * d, B * d), :].reshape(B, d, d)  # (B, d, d), sublane split
    x = slab_ref[pl.ds(2 * d + B * d, B), :]               # (B, d)

    # z[b, :] = Q @ x[b, :]   == contract x's last axis with q's last axis
    # (transposed-rhs matmul, consumed natively by the MXU -- no relayout).
    z = lax.dot_general(
        x, q,
        dimension_numbers=(((1,), (1,)), ((), ())),
        preferred_element_type=jnp.float32,
    )                                                      # (B, d)

    # y[b, :] = A[b] @ z[b, :]  -- VPU broadcast-mul + XLU lane reduce
    # (kept off the MXU on purpose: d=32 << MXU width).
    y = jnp.sum(a * z[:, None, :], axis=-1)                # (B, d)

    # out[b, :] = P @ y[b, :]  == contract y's last axis with p's last axis.
    out = lax.dot_general(
        y, p,
        dimension_numbers=(((1,), (1,)), ((), ())),
        preferred_element_type=jnp.float32,
    )                                                      # (B, d)

    o_ref[...] = out.astype(o_ref.dtype)


def pq_forward(P, Q, A, x):
    """Computes bmm(P @ A @ Q, x[..., None]).squeeze(-1) with a Pallas kernel."""
    B, d = x.shape
    # Pack all operands into one (2d + B*d + B, d) f32 slab -> single DMA.
    slab = jnp.concatenate(
        [
            P.astype(jnp.float32),
            Q.astype(jnp.float32),
            A.astype(jnp.float32).reshape(B * d, d),
            x.astype(jnp.float32),
        ],
        axis=0,
    )
    kernel = functools.partial(_pq_kernel, B=B, d=d)
    return pl.pallas_call(
        kernel,
        out_shape=jax.ShapeDtypeStruct((B, d), x.dtype),
        # Single invocation (no grid): whole slab resident in VMEM.
        in_specs=[pl.BlockSpec(memory_space=pltpu.MemorySpace.VMEM)],
        out_specs=pl.BlockSpec(memory_space=pltpu.MemorySpace.VMEM),
    )(slab)


if __name__ == "__main__":
    d = 32
    B = 4

    key = jax.random.PRNGKey(0)
    k_p, k_a, k_x = jax.random.split(key, 3)

    # Deterministic parameter init mirroring the module's __init__:
    #   M = randn(d, d); P = M; Q = inverse(M)
    P = jax.random.normal(k_p, (d, d), dtype=jnp.float32)
    Q = jnp.linalg.inv(P)

    A = jax.random.normal(k_a, (B, d, d), dtype=jnp.float32)
    x = jax.random.normal(k_x, (B, d), dtype=jnp.float32)

    out = jax.jit(pq_forward)(P, Q, A, x)
    out = jax.block_until_ready(out)

    # Pure-JAX reference check (mirrors the PyTorch forward exactly).
    mat_ref = jnp.einsum("ij,bjk,kl->bil", P, A, Q)
    out_ref = jnp.einsum("bij,bj->bi", mat_ref, x)
    assert out.shape == (B, d)

    # Q = inv(P) can be ill-conditioned for a random Gaussian P, so use a
    # scale-aware tolerance rather than a raw absolute one.
    scale = jnp.max(jnp.abs(out_ref)) + 1e-6
    max_rel_err = float(jnp.max(jnp.abs(out - out_ref)) / scale)
    assert max_rel_err < 1e-2, max_rel_err

    print("KERNEL_OK")
</pallas_src>

<mosaic_0001>
module attributes {stable_mosaic.version = 11 : i64} {
  func.func @_pq_kernel(%arg0: memref<196x32xf32, #tpu.memory_space<vmem>>, %arg1: memref<4x32xf32, #tpu.memory_space<vmem>>) attributes {dimension_semantics = [], scalar_prefetch = 0 : i64, scratch_operands = 0 : i64, tpu.core_type = #tpu.core_type<tc>} {
    %c0 = arith.constant 0 : index
    %c0_0 = arith.constant 0 : index
    %0 = vector.load %arg0[%c0, %c0_0] : memref<196x32xf32, #tpu.memory_space<vmem>>, vector<32x32xf32>
    %c32 = arith.constant 32 : index
    %c0_1 = arith.constant 0 : index
    %1 = vector.load %arg0[%c32, %c0_1] : memref<196x32xf32, #tpu.memory_space<vmem>>, vector<32x32xf32>
    %c64 = arith.constant 64 : index
    %c0_2 = arith.constant 0 : index
    %2 = vector.load %arg0[%c64, %c0_2] : memref<196x32xf32, #tpu.memory_space<vmem>>, vector<128x32xf32>
    %3 = vector.shape_cast %2 : vector<128x32xf32> to vector<4x32x32xf32>
    %c192 = arith.constant 192 : index
    %c0_3 = arith.constant 0 : index
    %4 = vector.load %arg0[%c192, %c0_3] : memref<196x32xf32, #tpu.memory_space<vmem>>, vector<4x32xf32>
    %cst = arith.constant dense<0.000000e+00> : vector<4x32xf32>
    %5 = tpu.matmul %4, %1, %cst {dimension_numbers = #tpu.dot_dimension_numbers<[1], [1], [0], [0], [0, 0, 1, 0], [], []>} : vector<4x32xf32>, vector<32x32xf32>, vector<4x32xf32> -> vector<4x32xf32>
    %6 = vector.shape_cast %5 : vector<4x32xf32> to vector<4x1x32xf32>
    %7 = vector.broadcast %6 : vector<4x1x32xf32> to vector<4x32x32xf32>
    %8 = arith.mulf %3, %7 : vector<4x32x32xf32>
    %cst_4 = arith.constant dense<0.000000e+00> : vector<4x32xf32>
    %9 = vector.multi_reduction <add>, %8, %cst_4 [2] : vector<4x32x32xf32> to vector<4x32xf32>
    %cst_5 = arith.constant dense<0.000000e+00> : vector<4x32xf32>
    %10 = tpu.matmul %9, %0, %cst_5 {dimension_numbers = #tpu.dot_dimension_numbers<[1], [1], [0], [0], [0, 0, 1, 0], [], []>} : vector<4x32xf32>, vector<32x32xf32>, vector<4x32xf32> -> vector<4x32xf32>
    %c0_6 = arith.constant 0 : index
    %c0_7 = arith.constant 0 : index
    %11 = vector.load %arg1[%c0_6, %c0_7] : memref<4x32xf32, #tpu.memory_space<vmem>>, vector<4x32xf32>
    tpu.vector_store %arg1[%c0_6, %c0_7], %10 {strides = array<i32>} : memref<4x32xf32, #tpu.memory_space<vmem>>, vector<4x32xf32>,
    return
  }
}

</mosaic_0001>

<bundles_post_ra>
// kernel: pq_forward.1
= control target key start
LH: loop header
LB: loop body
LE: loop exit
PB: predicated region body
PF: predicated region fallthrough
CT: control target
= control target key end

     0   :  { %vm34_vm0 = vcmask 261120   ;;  %v522_v2 = vmov 0.0|0.0   ;;  %vm523_vm2 = vmmov 0   ;;  %v524_v5 = vmov 0.0   ;;  %s682_s0 = inlined_call_operand.vmem [shape: f32[196,32], index: 0, kind: input, shape index: {}]   ;;  %s683_s1 = inlined_call_operand.hbm [shape: f32[4,32], index: 1, kind: output, shape index: {}]  }
   0x1   :  { %v13_v0 = vld [vmem:[%s682_s0 + $0x20] sm:$0xff]  ;;  %v14_v1 = vld [vmem:[%s682_s0 + $0x28] sm:$0xff]  ;;  %477 = vmatprep.subr.bf16.mxu0 %v522_v2  ;;  %vm546_vm1 = vmpackc.low %vm34_vm0, %vm34_vm0  ;;  %485 = vmatprep.subr.bf16.mxu1 %v522_v2 }
   0x2   :  { %v478_v3 = vpack.c.bf16 %v14_v1, %v13_v0  ;;  %463 = vmatprep.mubr.msk.f32.mxu0 %vm523_vm2, %v524_v5  ;;  %474 = vmatprep.mubr.msk.f32.mxu1 %vm523_vm2, %v524_v5 }
   0x3   :  { %6 = vsyncpa [#allocation3], 0  ;;  %v15_v6 = vld [vmem:[%s682_s0 + $0x30] sm:$0xff]  ;;  %v16_v7 = vld [vmem:[%s682_s0 + $0x38] sm:$0xff]  ;;  %v525_v10 = vmov 1966171168   ;;  %v124_v12 = vlaneseq }
   0x4   :  { %480 = vmatpush3.bf16.xpose.msk.msra.mxu0 %vm546_vm1, %v478_v3  ;;  %v482_v8 = vpack.c.bf16 %v16_v7, %v15_v6  ;;  %v33_v9 = vld [vmem:[%s682_s0 + $0xc0] sm:$0xf]  ;;  %v122_v11 = vunpack.c.l.s4 %v525_v10  ;;  %v18_v26 = vld [vmem:[%s682_s0 + $0x48] sm:$0xff]  ;;  %v19_v33 = vld [vmem:[%s682_s0 + $0x50] sm:$0xff]  ;;  %vm256_vm3 = vcmask 130112   ;;  %vm263_vm4 = vcmask 195712  }
   0x5   :  { %481 = vmatprep.subr.bf16.mxu0 %v522_v2  ;;  %v567_v14 = vshrl.u32 %v124_v12, 7  ;;  %v17_v22 = vld [vmem:[%s682_s0 + $0x40] sm:$0xff]  ;;  %v22_v29 = vld [vmem:[%s682_s0 + $0x68] sm:$0xff]  ;;  %v23_v37 = vld [vmem:[%s682_s0 + $0x70] sm:$0xff]  ;;  %vm270_vm5 = vcmask 261312   ;;  %vm329_vm6 = vcmask 1041409  }
   0x6   :  { %v123_v13 = vunpack.c.0.s8 %v122_v11  ;;  %v21_v25 = vld [vmem:[%s682_s0 + $0x60] sm:$0xff]  ;;  %v20_v40 = vld [vmem:[%s682_s0 + $0x58] sm:$0xff]  ;;  %v26_v44 = vld [vmem:[%s682_s0 + $0x88] sm:$0xff]  ;;  %vm331_vm7 = vcmask 1042434   ;;  %vm333_vm8 = vcmask 1043459   ;;  %vm419_vm9 = vcmask 257024  }
   0x7   :  { %v147_v18 = vsub.s32 0, %v567_v14  ;;  %v25_v47 = vld [vmem:[%s682_s0 + $0x80] sm:$0xff]  ;;  %v24_v50 = vld [vmem:[%s682_s0 + $0x78] sm:$0xff]  ;;  %v27_v54 = vld [vmem:[%s682_s0 + $0x90] sm:$0xff] }
   0x8   :  { %v126_v15 = vsub.s32 %v123_v13, %v567_v14  ;;  %v28_v57 = vld [vmem:[%s682_s0 + $0x98] sm:$0xff]  ;;  %v30_v61 = vld [vmem:[%s682_s0 + $0xa8] sm:$0xff]  ;;  %v29_v0 = vld [vmem:[%s682_s0 + $0xa0] sm:$0xff] }
   0x9   :  { %v31_v5 = vld [vmem:[%s682_s0 + $0xb0] sm:$0xff] }
   0xc   :  { %484 = vmatpush3.bf16.xpose.msk.msra.mxu0 %vm546_vm1, %v482_v8  ;;  %v32_v8 = vld [vmem:[%s682_s0 + $0xb8] sm:$0xff] }
  0x13   :  { %464 = vmatmul.mubr.msk.f32.vlgmr.msra.gmra.mrb[0].mxu0 %vm34_vm0, %v33_v9 }
  0xe6   :  { %v116_v16 = vpop.f32.mrb[0].mxu0 }
  0xe7   :  { %v127_v17 = vrot.slane %v116_v16, %v126_v15  ;;  %v465_v19 = vpop.f32.mrb[1].mxu0 }
  0xe9   :  { %v128_v20 = vcombine.high %v127_v17, %v127_v17  ;;  %v135_v21 = vrot.slane %v127_v17, %v126_v15  ;;  %v9_v17 = vld [vmem:[%s682_s0] sm:$0xff] }
  0xeb   :  { %v142_v23 = vrot.slane %v128_v20, %v126_v15  ;;  %v148_v24 = vrot.slane %v135_v21, %v147_v18  ;;  %v143_v34 = vcombine.high %v135_v21, %v135_v21  ;;  %v11_v20 = vld [vmem:[%s682_s0 + $0x10] sm:$0xff]  ;;  %v12_v21 = vld [vmem:[%s682_s0 + $0x18] sm:$0xff] }
  0xed   :  { %v152_v27 = vrot.slane %v142_v23, %v147_v18  ;;  %v165_v28 = vmul.f32 %v148_v24, %v17_v22  ;;  %v166_v32 = vmul.f32 %v148_v24, %v18_v26  ;;  %v167_v39 = vmul.f32 %v148_v24, %v19_v33 }
  0xee   :  { %v156_v41 = vrot.slane %v143_v34, %v147_v18  ;;  %v168_v46 = vmul.f32 %v148_v24, %v20_v40  ;;  %v144_v51 = vcombine.high %v142_v23, %v142_v23  ;;  %v490_v22 = vpack.c.bf16 %v12_v21, %v11_v20 }
  0xef   :  { %v181_v30 = vsel %vm34_vm0, %v165_v28, 0.0  ;;  %v169_v31 = vmul.f32 %v152_v27, %v21_v25  ;;  %v170_v36 = vmul.f32 %v152_v27, %v22_v29  ;;  %v184_v38 = vsel %vm34_vm0, %v166_v32, 0.0 }
  0xf0   :  { %182 = vadd.xlane.f32.xlu0 %v181_v30  ;;  %v171_v43 = vmul.f32 %v152_v27, %v23_v37  ;;  %v187_v45 = vsel %vm34_vm0, %v167_v39, 0.0  ;;  %v174_v49 = vmul.f32 %v156_v41, %v26_v44  ;;  %v190_v52 = vsel %vm34_vm0, %v168_v46, 0.0 }
  0xf1   :  { %v193_v35 = vsel %vm34_vm0, %v169_v31, 0.0  ;;  %v196_v42 = vsel %vm34_vm0, %v170_v36, 0.0  ;;  %v173_v53 = vmul.f32 %v156_v41, %v25_v47  ;;  %v172_v56 = vmul.f32 %v152_v27, %v24_v50 }
  0xf2   :  { %194 = vadd.xlane.f32.xlu1 %v193_v35  ;;  %v199_v48 = vsel %vm34_vm0, %v171_v43, 0.0  ;;  %v208_v55 = vsel %vm34_vm0, %v174_v49, 0.0  ;;  %v160_v58 = vrot.slane %v144_v51, %v147_v18  ;;  %v175_v60 = vmul.f32 %v156_v41, %v27_v54  ;;  %v10_v18 = vld [vmem:[%s682_s0 + $0x8] sm:$0xff]  ;;  %s526_s0 = smov [#allocation2]  }
  0xf3   :  { %v205_v59 = vsel %vm34_vm0, %v173_v53, 0.0  ;;  %v202_v62 = vsel %vm34_vm0, %v172_v56, 0.0  ;;  %v176_v63 = vmul.f32 %v156_v41, %v28_v57  ;;  %v486_v19 = vpack.c.bf16 %v10_v18, %v9_v17  ;;  %s427_s27 = sshll.u32 %s526_s0, 4  ;;  %s428_s27 = int_to_ptr.vmem [resolvable:$true] %s427_s27 }
  0xf4   :  { %185 = vadd.xlane.f32.xlu0 %v184_v38  ;;  %v211_v1 = vsel %vm34_vm0, %v175_v60, 0.0  ;;  %v178_v3 = vmul.f32 %v160_v58, %v30_v61  ;;  %v177_v7 = vmul.f32 %v160_v58, %v29_v0  ;;  %v179_v10 = vmul.f32 %v160_v58, %v31_v5  ;;  %s498_s28 = scalar_lea.vmem %s428_s27, 64  ;;  %p503_p1 = scmp.lt.s32.totalorder %s428_s27, %s428_s27 }
  0xf5   :  { %v214_v6 = vsel %vm34_vm0, %v176_v63, 0.0  ;;  %v180_v13 = vmul.f32 %v160_v58, %v32_v8  ;;  %488 = vmatpush3.bf16.xpose.msk.msra.mxu1 %vm546_vm1, %v486_v19  ;;  %p499_p0 = scmp.ne.s32.totalorder %s428_s27, %s498_s28  ;;  %p504_p2 = scmp.lt.s32.totalorder %s498_s28, %s498_s28 }
  0xf6   :  { %197 = vadd.xlane.f32.xlu1 %v196_v42  ;;  %v220_v9 = vsel %vm34_vm0, %v178_v3, 0.0  ;;  %v217_v11 = vsel %vm34_vm0, %v177_v7, 0.0  ;;  %v223_v15 = vsel %vm34_vm0, %v179_v10, 0.0  ;;  %489 = vmatprep.subr.bf16.mxu1 %v522_v2  ;;  %v246_v2 = vand.u32 127, %v124_v12 }
  0xf7   :  { %v226_v16 = vsel %vm34_vm0, %v180_v13, 0.0  ;;  %p505_p3 = por %p504_p2, %p503_p1 }
  0xf8   :  { %188 = vadd.xlane.f32.xlu0 %v187_v45  ;;  %v251_v31 = vadd.s32 4294967288, %v246_v2  ;;  %v258_v33 = vadd.s32 4294967280, %v246_v2  ;;  %v265_v35 = vadd.s32 4294967272, %v246_v2  ;;  %v249_v36 = vsub.s32 %v246_v2, %v567_v14 }
  0xf9   :  { %p506_p4 = pnand %p505_p3, %p499_p0 }
  0xfa   :  { %200 = vadd.xlane.f32.xlu1 %v199_v48  ;;  %v254_v4 = vsub.s32 %v251_v31, %v567_v14  ;;  %v261_v38 = vsub.s32 %v258_v33, %v567_v14  ;;  %v268_v42 = vsub.s32 %v265_v35, %v567_v14 }
  0xfc   :  { %191 = vadd.xlane.f32.xlu0 %v190_v52 }
  0xfd   :  { %492 = vmatpush3.bf16.xpose.msk.msra.mxu1 %vm546_vm1, %v490_v22 }
  0xfe   :  { %209 = vadd.xlane.f32.xlu1 %v208_v55 }
 0x100   :  { %206 = vadd.xlane.f32.xlu0 %v205_v59 }
 0x102   :  { %203 = vadd.xlane.f32.xlu1 %v202_v62 }
 0x104   :  { %212 = vadd.xlane.f32.xlu0 %v211_v1 }
 0x106   :  { %215 = vadd.xlane.f32.xlu1 %v214_v6 }
 0x108   :  { %221 = vadd.xlane.f32.xlu0 %v220_v9 }
 0x10a   :  { %218 = vadd.xlane.f32.xlu1 %v217_v11 }
 0x10c   :  { %224 = vadd.xlane.f32.xlu0 %v223_v15 }
 0x10e   :  { %227 = vadd.xlane.f32.xlu1 %v226_v16 }
 0x17d   :  { %v183_v23 = vpop.xlane.xlu0 %182 }
 0x17e   :  { %v250_v47 = vrot.slane %v183_v23, %v249_v36 }
 0x17f   :  { %v195_v24 = vpop.xlane.xlu1 %194 }
 0x180   :  { %v275_v12 = vrot.slane %v195_v24, %v249_v36 }
 0x181   :  { %v186_v25 = vpop.xlane.xlu0 %185 }
 0x182   :  { %v255_v48 = vrot.slane %v186_v25, %v254_v4 }
 0x183   :  { %v198_v26 = vpop.xlane.xlu1 %197 }
 0x184   :  { %v279_v39 = vrot.slane %v198_v26, %v254_v4  ;;  %v257_v60 = vsel %vm256_vm3, %v255_v48, %v250_v47 }
 0x185   :  { %v189_v27 = vpop.xlane.xlu0 %188 }
 0x186   :  { %v280_v50 = vsel %vm256_vm3, %v279_v39, %v275_v12  ;;  %v262_v51 = vrot.slane %v189_v27, %v261_v38 }
 0x187   :  { %v201_v28 = vpop.xlane.xlu1 %200 }
 0x188   :  { %v284_v44 = vrot.slane %v201_v28, %v261_v38  ;;  %v264_v0 = vsel %vm263_vm4, %v262_v51, %v257_v60 }
 0x189   :  { %v192_v29 = vpop.xlane.xlu0 %191 }
 0x18a   :  { %v269_v55 = vrot.slane %v192_v29, %v268_v42  ;;  %v285_v58 = vsel %vm263_vm4, %v284_v44, %v280_v50 }
 0x18b   :  { %v210_v30 = vpop.xlane.xlu1 %209 }
 0x18c   :  { %v298_v45 = vrot.slane %v210_v30, %v254_v4  ;;  %v271_v5 = vsel %vm270_vm5, %v269_v55, %v264_v0 }
 0x18d   :  { %v207_v32 = vpop.xlane.xlu0 %206 }
 0x18e   :  { %v294_v40 = vrot.slane %v207_v32, %v249_v36 }
 0x18f   :  { %v204_v34 = vpop.xlane.xlu1 %203 }
 0x190   :  { %v289_v49 = vrot.slane %v204_v34, %v268_v42  ;;  %v299_v52 = vsel %vm256_vm3, %v298_v45, %v294_v40 }
 0x191   :  { %v213_v37 = vpop.xlane.xlu0 %212 }
 0x192   :  { %v303_v43 = vrot.slane %v213_v37, %v261_v38  ;;  %v290_v61 = vsel %vm270_vm5, %v289_v49, %v285_v58 }
 0x193   :  { %v216_v41 = vpop.xlane.xlu1 %215  ;;  %v330_v8 = vsel %vm329_vm6, %v290_v61, %v271_v5 }
 0x194   :  { %v308_v53 = vrot.slane %v216_v41, %v268_v42  ;;  %v304_v14 = vsel %vm263_vm4, %v303_v43, %v299_v52 }
 0x195   :  { %v222_v46 = vpop.xlane.xlu0 %221 }
 0x196   :  { %v317_v56 = vrot.slane %v222_v46, %v254_v4  ;;  %v309_v1 = vsel %vm270_vm5, %v308_v53, %v304_v14 }
 0x197   :  { %v219_v54 = vpop.xlane.xlu1 %218  ;;  %v332_v10 = vsel %vm331_vm7, %v309_v1, %v330_v8 }
 0x198   :  { %v313_v57 = vrot.slane %v219_v54, %v249_v36 }
 0x199   :  { %v225_v59 = vpop.xlane.xlu0 %224 }
 0x19a   :  { %v318_v62 = vsel %vm256_vm3, %v317_v56, %v313_v57  ;;  %v322_v63 = vrot.slane %v225_v59, %v261_v38 }
 0x19b   :  { %v228_v3 = vpop.xlane.xlu1 %227 }
 0x19c   :  { %v323_v6 = vsel %vm263_vm4, %v322_v63, %v318_v62  ;;  %v327_v7 = vrot.slane %v228_v3, %v268_v42 }
 0x19e   :  { %v328_v9 = vsel %vm270_vm5, %v327_v7, %v323_v6 }
 0x19f   :  { %v334_v11 = vsel %vm333_vm8, %v328_v9, %v332_v10 }
 0x1a0   :  { %475 = vmatmul.mubr.msk.f32.vlgmr.msra.gmra.mrb[0].mxu1 %vm34_vm0, %v334_v11 }
 0x273   :  { %v415_v13 = vpop.f32.mrb[0].mxu1 }
 0x274   :  { %420 = vst.msk [vmem:[#allocation2] sm:$0xf] %vm419_vm9, %v415_v13  ;;  %v476_v15 = vpop.f32.mrb[1].mxu1 }
 0x275   :  { %509 = shalt.err (!%p506_p4)
}
 0x276   :  { %s510_s2 = scalar_lea.hbm %s683_s1, 64 }
 0x277   :  { %p511_p5 = scmp.ne.s32.totalorder %s683_s1, %s510_s2  ;;  %p514_p6 = scmp.lt.u32.totalorder %s510_s2, %s683_s1 }
 0x279   :  { %p516_p7 = pnand %p514_p6, %p511_p5 }
 0x27b   :  { %519 = shalt.err (!%p516_p7)
}
 0x27c   :  { %430 = dma.vmem_to_hbm [thread:$0]  %s428_s27, 64, %s683_s1, [#allocation3]  }
 0x27d   :  { %520 = dma.done.wait [#allocation3], 64  }
 0x27e   :  { %521 = vsyncadd [#allocation3], 4294967232 }
 0x27f   :  { %434 = vsyncpa [#allocation3], 1 }

</bundles_post_ra>
